<compile_context>
chip_gen: v6e
topology: v6e:2x2x1
jax: 0.10.0
libtpu: 0.0.40
codegen_flags: <defaults>
</compile_context>

<pallas_src>
import functools

import jax
import jax.numpy as jnp
from jax.experimental import pallas as pl
from jax.experimental.pallas import tpu as pltpu


def _rup(x, m):
    return ((x + m - 1) // m) * m


def _physical_vmem_bytes():
    # ~128 MiB on v5e/v6e, 64 MiB per TensorCore on v7x.  Conservative
    # fallback if the query is unavailable.
    try:
        return int(pltpu.get_tpu_info().vmem_capacity_bytes)
    except Exception:
        return 64 * 1024 * 1024


def _downsample_kernel(x_ref, w_ref, o_ref, col_ref, *, nb, ho, wo, k_tap,
                       use_normalizer, eps, neg_slope):
    # x_ref:   (Nb, Ho+1, Wo+1, 4*Cin)  stride-2 space-to-depth padded input
    # w_ref:   (16*Cin, Tco)            fused conv weights, one Cout tile
    # o_ref:   (Nb, Ho*Wo, Tco)
    # col_ref: (Nb*Ho*Wo, 16*Cin)       VMEM scratch (im2col of this block)
    hw = ho * wo
    rows = nb * hw

    # Assemble the 4 (di, dj) taps into one fused-K matrix so the convolution
    # is a single, well-fed MXU matmul instead of 4 small-K ones.
    for di in range(2):
        for dj in range(2):
            tap = x_ref[:, di:di + ho, dj:dj + wo, :]        # (Nb, Ho, Wo, 4Cin)
            lo = (2 * di + dj) * k_tap
            col_ref[:, lo:lo + k_tap] = tap.reshape(rows, k_tap)

    # Conv: one f32-accumulating MXU matmul (no zero-init + add passes).
    y = jnp.dot(col_ref[...], w_ref[...],
                preferred_element_type=jnp.float32)          # (rows, Tco)
    y = y.reshape(nb, hw, y.shape[-1])

    if use_normalizer:
        # InstanceNorm2d: normalize over spatial dims per (sample, channel),
        # biased variance, eps inside rsqrt, no affine (PyTorch defaults).
        # Single-pass stats; padded channels are identically zero -> stay zero.
        inv_hw = 1.0 / hw
        mean = jnp.sum(y, axis=1, keepdims=True) * inv_hw        # (Nb, 1, Tco)
        msq = jnp.sum(y * y, axis=1, keepdims=True) * inv_hw     # E[y^2]
        var = jnp.maximum(msq - mean * mean, 0.0)
        y = (y - mean) * jax.lax.rsqrt(var + eps)

    # LeakyReLU(0.2)
    y = jnp.where(y >= 0, y, neg_slope * y)
    o_ref[...] = y.astype(o_ref.dtype)


def downsample_block(x_nchw, weight, *, use_normalizer: bool = True,
                     eps: float = 1e-5, compute_dtype=jnp.bfloat16,
                     cout_tile=None, nchw_output: bool = True):
    """x_nchw: (N, Cin, H, W); weight: (Cout, Cin, 4, 4). Returns NCHW (or NHWC)."""
    N, Cin, H, W = x_nchw.shape
    Cout, Cin_w, KH, KW = weight.shape
    assert Cin_w == Cin and KH == 4 and KW == 4, "DownsampleBlock uses 4x4 kernels"
    assert H % 2 == 0 and W % 2 == 0, "stride-2 downsample expects even H, W"

    Ho, Wo = H // 2, W // 2
    HW = Ho * Wo
    K = 4 * Cin                       # (p, q, c) features per (di, dj) tap
    K4 = 4 * K                        # fused contraction depth (= 16*Cin)
    Coutp = _rup(Cout, 128)           # lane-dense output channels
    out_dtype = x_nchw.dtype

    # Cout tile: 256 matches the v6e/v7x MXU width; pass cout_tile=128 on v5e.
    if cout_tile is None:
        cout_tile = 256 if Coutp % 256 == 0 else 128
    assert Coutp % cout_tile == 0
    n_cout = Coutp // cout_tile

    itm = jnp.dtype(compute_dtype).itemsize
    oitm = jnp.dtype(out_dtype).itemsize

    def _block_bytes(nb):
        # Double-buffered input/output/weight blocks + im2col scratch + f32
        # temporaries, with (8, 128) tile padding accounted for.
        in_b = nb * (Ho + 1) * _rup(Wo + 1, 8) * _rup(K, 128) * itm
        col_b = _rup(nb * HW, 8) * _rup(K4, 128) * itm
        out_b = nb * _rup(HW, 8) * cout_tile * oitm
        w_b = _rup(K4, 8) * cout_tile * itm
        acc_b = 2 * nb * HW * cout_tile * 4
        return 2 * in_b + col_b + 2 * out_b + 2 * w_b + acc_b

    phys_vmem = _physical_vmem_bytes()
    budget = int(phys_vmem * 0.55)

    # Batch blocking: biggest divisor of N whose block fits the VMEM budget,
    # amortizing per-grid-step overhead for small feature maps.
    Nb = 1
    for cand in range(1, N + 1):
        if N % cand == 0 and _block_bytes(cand) <= budget:
            Nb = cand
    need = _block_bytes(Nb)
    # Leave headroom: ~80% of physical VMEM max (compiler internal scratch,
    # pipeline buffers), but never less than 32 MiB.
    vmem_limit = int(min(phys_vmem * 0.8,
                         max(32 * 1024 * 1024, need + (8 << 20))))

    # ---- wrapper glue (1x-bytes layout pass; no im2col tensor in HBM) ----
    # NHWC + spatial pad, then stride-2 space-to-depth:
    #   x_s2d[n, i, j, (p, q, c)] = x_pad[n, 2i+p, 2j+q, c]
    x_nhwc = jnp.transpose(x_nchw, (0, 2, 3, 1))
    x_pad = jnp.pad(x_nhwc, ((0, 0), (1, 1), (1, 1), (0, 0)))
    x_s2d = (x_pad.reshape(N, Ho + 1, 2, Wo + 1, 2, Cin)
             .transpose(0, 1, 3, 2, 4, 5)
             .reshape(N, Ho + 1, Wo + 1, K)).astype(compute_dtype)

    # Fused weights: row index = (2*di+dj)*4Cin + (2*p+q)*Cin + c, matching
    # the in-kernel tap assembly order; lane-padded Cout, cast to bf16/f32.
    wt = weight.transpose(2, 3, 1, 0).reshape(2, 2, 2, 2, Cin, Cout)  # di,p,dj,q,c,co
    wt = wt.transpose(0, 2, 1, 3, 4, 5).reshape(K4, Cout)
    w_fused = jnp.pad(wt, ((0, 0), (0, Coutp - Cout))).astype(compute_dtype)

    kernel = functools.partial(
        _downsample_kernel, nb=Nb, ho=Ho, wo=Wo, k_tap=K,
        use_normalizer=use_normalizer, eps=eps, neg_slope=0.2)

    cost = pl.CostEstimate(
        flops=2 * N * HW * K4 * Coutp,
        transcendentals=(N * Coutp if use_normalizer else 0),
        bytes_accessed=int(x_s2d.size * itm + w_fused.size * itm
                           + N * HW * Coutp * oitm),
    )

    out = pl.pallas_call(
        kernel,
        out_shape=jax.ShapeDtypeStruct((N, HW, Coutp), out_dtype),
        grid_spec=pltpu.PrefetchScalarGridSpec(
            num_scalar_prefetch=0,
            grid=(N // Nb, n_cout),
            in_specs=[
                # Input block index is constant along the Cout axis -> block
                # stays resident (no re-DMA) while Cout tiles sweep.
                pl.BlockSpec((Nb, Ho + 1, Wo + 1, K), lambda b, c: (b, 0, 0, 0)),
                pl.BlockSpec((K4, cout_tile), lambda b, c: (0, c)),
            ],
            out_specs=pl.BlockSpec((Nb, HW, cout_tile), lambda b, c: (b, 0, c)),
            scratch_shapes=[pltpu.VMEM((Nb * HW, K4), compute_dtype)],
        ),
        compiler_params=pltpu.CompilerParams(
            dimension_semantics=("parallel", "parallel"),
            vmem_limit_bytes=vmem_limit,
        ),
        cost_estimate=cost,
    )(x_s2d, w_fused)

    out = out[:, :, :Cout].reshape(N, Ho, Wo, Cout)     # drop lane padding
    if nchw_output:
        out = jnp.transpose(out, (0, 3, 1, 2))          # back to NCHW
    return out


def _reference(x_nchw, weight, *, use_normalizer: bool, eps: float = 1e-5,
               compute_dtype=jnp.float32):
    """Pure-JAX reference (XLA conv) with matching operand dtype."""
    xc = x_nchw.astype(compute_dtype)
    wc = weight.astype(compute_dtype)
    y = jax.lax.conv_general_dilated(
        xc, wc, window_strides=(2, 2), padding=((1, 1), (1, 1)),
        dimension_numbers=("NCHW", "OIHW", "NCHW"),
        preferred_element_type=jnp.float32)
    if use_normalizer:
        mean = jnp.mean(y, axis=(2, 3), keepdims=True)
        var = jnp.mean((y - mean) ** 2, axis=(2, 3), keepdims=True)
        y = (y - mean) * jax.lax.rsqrt(var + eps)
    return jnp.where(y >= 0, y, 0.2 * y).astype(x_nchw.dtype)


if __name__ == "__main__":
    key = jax.random.PRNGKey(0)
    kx, kw = jax.random.split(key)

    N, Cin, H, W = 2, 4, 16, 16
    Cout = 8

    x = jax.random.normal(kx, (N, Cin, H, W), dtype=jnp.float32)
    # DCGAN-style N(0, 0.02) init.
    weight = 0.02 * jax.random.normal(kw, (Cout, Cin, 4, 4), dtype=jnp.float32)

    # 1) f32 operands, with InstanceNorm.
    out = jax.block_until_ready(
        downsample_block(x, weight, use_normalizer=True,
                         compute_dtype=jnp.float32))
    ref = _reference(x, weight, use_normalizer=True, compute_dtype=jnp.float32)
    assert out.shape == (N, Cout, H // 2, W // 2)
    assert jnp.allclose(out, ref, atol=1e-3, rtol=1e-3), "f32 norm path mismatch"

    # 2) bf16 matmul operands (f32 accumulation + f32 norm), with InstanceNorm.
    out_bf = jax.block_until_ready(
        downsample_block(x, weight, use_normalizer=True,
                         compute_dtype=jnp.bfloat16))
    ref_bf = _reference(x, weight, use_normalizer=True,
                        compute_dtype=jnp.bfloat16)
    assert jnp.allclose(out_bf, ref_bf, atol=5e-3, rtol=5e-3), "bf16 path mismatch"

    # 3) f32, no normalizer (use_normalizer=False branch of the module).
    out_nn = jax.block_until_ready(
        downsample_block(x, weight, use_normalizer=False,
                         compute_dtype=jnp.float32))
    ref_nn = _reference(x, weight, use_normalizer=False,
                        compute_dtype=jnp.float32)
    assert jnp.allclose(out_nn, ref_nn, atol=1e-3, rtol=1e-3), "no-norm path mismatch"

    print("KERNEL_OK")
</pallas_src>

<mosaic_0001>
module attributes {stable_mosaic.version = 11 : i64} {
  func.func @_downsample_kernel(%arg0: i32, %arg1: i32, %arg2: memref<2x9x9x16xf32, #tpu.memory_space<vmem>>, %arg3: memref<64x128xf32, #tpu.memory_space<vmem>>, %arg4: memref<2x64x128xf32, #tpu.memory_space<vmem>>, %arg5: memref<128x64xf32, #tpu.memory_space<vmem>>) attributes {dimension_semantics = [#tpu.dimension_semantics<parallel>, #tpu.dimension_semantics<parallel>], iteration_bounds = array<i64: 1, 1>, scalar_prefetch = 0 : i64, scratch_operands = 1 : i64, tpu.core_type = #tpu.core_type<tc>, window_params = [{transform_indices = @transform_0, window_bounds = array<i64: 2, 9, 9, 16>}, {transform_indices = @transform_1, window_bounds = array<i64: 64, 128>}, {transform_indices = @transform_2, window_bounds = array<i64: 2, 64, 128>}]} {
    %c0 = arith.constant 0 : index
    %c0_0 = arith.constant 0 : index
    %c0_1 = arith.constant 0 : index
    %c0_2 = arith.constant 0 : index
    %0 = vector.load %arg2[%c0, %c0_0, %c0_1, %c0_2] : memref<2x9x9x16xf32, #tpu.memory_space<vmem>>, vector<2x8x8x16xf32>
    %1 = vector.shape_cast %0 : vector<2x8x8x16xf32> to vector<128x16xf32>
    %c0_3 = arith.constant 0 : index
    %c0_4 = arith.constant 0 : index
    %2 = vector.load %arg5[%c0_3, %c0_4] : memref<128x64xf32, #tpu.memory_space<vmem>>, vector<128x16xf32>
    tpu.vector_store %arg5[%c0_3, %c0_4], %1 {strides = array<i32>} : memref<128x64xf32, #tpu.memory_space<vmem>>, vector<128x16xf32>,
    %c0_5 = arith.constant 0 : index
    %c0_6 = arith.constant 0 : index
    %c1 = arith.constant 1 : index
    %c0_7 = arith.constant 0 : index
    %3 = vector.load %arg2[%c0_5, %c0_6, %c1, %c0_7] : memref<2x9x9x16xf32, #tpu.memory_space<vmem>>, vector<2x8x8x16xf32>
    %4 = vector.shape_cast %3 : vector<2x8x8x16xf32> to vector<128x16xf32>
    %c0_8 = arith.constant 0 : index
    %c16 = arith.constant 16 : index
    %5 = vector.load %arg5[%c0_8, %c16] : memref<128x64xf32, #tpu.memory_space<vmem>>, vector<128x16xf32>
    tpu.vector_store %arg5[%c0_8, %c16], %4 {strides = array<i32>} : memref<128x64xf32, #tpu.memory_space<vmem>>, vector<128x16xf32>,
    %c0_9 = arith.constant 0 : index
    %c1_10 = arith.constant 1 : index
    %c0_11 = arith.constant 0 : index
    %c0_12 = arith.constant 0 : index
    %6 = vector.load %arg2[%c0_9, %c1_10, %c0_11, %c0_12] : memref<2x9x9x16xf32, #tpu.memory_space<vmem>>, vector<2x8x8x16xf32>
    %7 = vector.shape_cast %6 : vector<2x8x8x16xf32> to vector<128x16xf32>
    %c0_13 = arith.constant 0 : index
    %c32 = arith.constant 32 : index
    %8 = vector.load %arg5[%c0_13, %c32] : memref<128x64xf32, #tpu.memory_space<vmem>>, vector<128x16xf32>
    tpu.vector_store %arg5[%c0_13, %c32], %7 {strides = array<i32>} : memref<128x64xf32, #tpu.memory_space<vmem>>, vector<128x16xf32>,
    %c0_14 = arith.constant 0 : index
    %c1_15 = arith.constant 1 : index
    %c1_16 = arith.constant 1 : index
    %c0_17 = arith.constant 0 : index
    %9 = vector.load %arg2[%c0_14, %c1_15, %c1_16, %c0_17] : memref<2x9x9x16xf32, #tpu.memory_space<vmem>>, vector<2x8x8x16xf32>
    %10 = vector.shape_cast %9 : vector<2x8x8x16xf32> to vector<128x16xf32>
    %c0_18 = arith.constant 0 : index
    %c48 = arith.constant 48 : index
    %11 = vector.load %arg5[%c0_18, %c48] : memref<128x64xf32, #tpu.memory_space<vmem>>, vector<128x16xf32>
    tpu.vector_store %arg5[%c0_18, %c48], %10 {strides = array<i32>} : memref<128x64xf32, #tpu.memory_space<vmem>>, vector<128x16xf32>,
    %c0_19 = arith.constant 0 : index
    %c0_20 = arith.constant 0 : index
    %12 = vector.load %arg5[%c0_19, %c0_20] : memref<128x64xf32, #tpu.memory_space<vmem>>, vector<128x64xf32>
    %c0_21 = arith.constant 0 : index
    %c0_22 = arith.constant 0 : index
    %13 = vector.load %arg3[%c0_21, %c0_22] : memref<64x128xf32, #tpu.memory_space<vmem>>, vector<64x128xf32>
    %cst = arith.constant dense<0.000000e+00> : vector<128x128xf32>
    %14 = tpu.matmul %12, %13, %cst {dimension_numbers = #tpu.dot_dimension_numbers<[1], [0], [0], [1], [0, 0, 1, 1], [], []>} : vector<128x64xf32>, vector<64x128xf32>, vector<128x128xf32> -> vector<128x128xf32>
    %15 = vector.shape_cast %14 : vector<128x128xf32> to vector<2x64x128xf32>
    %cst_23 = arith.constant dense<0.000000e+00> : vector<2x128xf32>
    %16 = vector.multi_reduction <add>, %15, %cst_23 [1] : vector<2x64x128xf32> to vector<2x128xf32>
    %17 = vector.shape_cast %16 : vector<2x128xf32> to vector<2x1x128xf32>
    %cst_24 = arith.constant 1.562500e-02 : f32
    %18 = vector.broadcast %cst_24 : f32 to vector<2x1x128xf32>
    %19 = arith.mulf %17, %18 : vector<2x1x128xf32>
    %20 = arith.mulf %15, %15 : vector<2x64x128xf32>
    %cst_25 = arith.constant dense<0.000000e+00> : vector<2x128xf32>
    %21 = vector.multi_reduction <add>, %20, %cst_25 [1] : vector<2x64x128xf32> to vector<2x128xf32>
    %22 = vector.shape_cast %21 : vector<2x128xf32> to vector<2x1x128xf32>
    %cst_26 = arith.constant 1.562500e-02 : f32
    %23 = vector.broadcast %cst_26 : f32 to vector<2x1x128xf32>
    %24 = arith.mulf %22, %23 : vector<2x1x128xf32>
    %25 = arith.mulf %19, %19 : vector<2x1x128xf32>
    %26 = arith.subf %24, %25 : vector<2x1x128xf32>
    %cst_27 = arith.constant 0.000000e+00 : f32
    %27 = vector.broadcast %cst_27 : f32 to vector<2x1x128xf32>
    %28 = arith.maximumf %26, %27 : vector<2x1x128xf32>
    %29 = vector.broadcast %19 : vector<2x1x128xf32> to vector<2x64x128xf32>
    %30 = arith.subf %15, %29 : vector<2x64x128xf32>
    %cst_28 = arith.constant 9.99999974E-6 : f32
    %31 = vector.broadcast %cst_28 : f32 to vector<2x1x128xf32>
    %32 = arith.addf %28, %31 : vector<2x1x128xf32>
    %33 = math.rsqrt %32 : vector<2x1x128xf32>
    %34 = vector.broadcast %33 : vector<2x1x128xf32> to vector<2x64x128xf32>
    %35 = arith.mulf %30, %34 : vector<2x64x128xf32>
    %cst_29 = arith.constant 0.000000e+00 : f32
    %36 = vector.broadcast %cst_29 : f32 to vector<2x64x128xf32>
    %37 = arith.cmpf oge, %35, %36 : vector<2x64x128xf32>
    %cst_30 = arith.constant 2.000000e-01 : f32
    %38 = vector.broadcast %cst_30 : f32 to vector<2x64x128xf32>
    %39 = arith.mulf %38, %35 : vector<2x64x128xf32>
    %40 = arith.select %37, %35, %39 : vector<2x64x128xi1>, vector<2x64x128xf32>
    %c0_31 = arith.constant 0 : index
    %c0_32 = arith.constant 0 : index
    %c0_33 = arith.constant 0 : index
    %41 = vector.load %arg4[%c0_31, %c0_32, %c0_33] : memref<2x64x128xf32, #tpu.memory_space<vmem>>, vector<2x64x128xf32>
    tpu.vector_store %arg4[%c0_31, %c0_32, %c0_33], %40 {strides = array<i32>} : memref<2x64x128xf32, #tpu.memory_space<vmem>>, vector<2x64x128xf32>,
    return
  }
  func.func @transform_0(%arg0: i32, %arg1: i32) -> (i32, i32, i32, i32) {
    %c0_i32 = arith.constant 0 : i32
    %c0_i32_0 = arith.constant 0 : i32
    %c0_i32_1 = arith.constant 0 : i32
    %c0_i32_2 = arith.constant 0 : i32
    return %arg0, %c0_i32, %c0_i32_0, %c0_i32_1 : i32, i32, i32, i32
  }
  func.func @transform_1(%arg0: i32, %arg1: i32) -> (i32, i32) {
    %c0_i32 = arith.constant 0 : i32
    %c0_i32_0 = arith.constant 0 : i32
    return %c0_i32, %arg1 : i32, i32
  }
  func.func @transform_2(%arg0: i32, %arg1: i32) -> (i32, i32, i32) {
    %c0_i32 = arith.constant 0 : i32
    %c0_i32_0 = arith.constant 0 : i32
    return %arg0, %c0_i32, %arg1 : i32, i32, i32
  }
}

</mosaic_0001>

<bundles_post_ra>
// kernel: tpu_custom_call.1
= control target key start
LH: loop header
LB: loop body
LE: loop exit
PB: predicated region body
PF: predicated region fallthrough
CT: control target
= control target key end

     0   :  { %s909_s15 = smov 16   ;;  %vm28_vm0 = vcmask 130048   ;;  %s910_s14 = smov 32   ;;  %s1357_s0 = inlined_call_operand.vmem [shape: f32[2,9,9,16], index: 0, kind: input, shape index: {}]   ;;  %s1358_s1 = inlined_call_operand.vmem [shape: f32[64,128], index: 1, kind: input, shape index: {}]   ;;  %s1359_s2 = inlined_call_operand.hbm [shape: f32[2,64,128], index: 2, kind: output, shape index: {}]  }
   0x1   :  { %v46_v0 = vld [vmem:[%s1357_s0 + $0x11] sm:$0xff]  ;;  %v45_v1 = vld [vmem:[%s1357_s0 + $0x1] sm:$0xff] }
   0x2   :  { %v54_v2 = vld [vmem:[%s1357_s0 + $0xa1] sm:$0xff]  ;;  %79 = vrot.lane.b32.xlu1 %v46_v0, %s909_s15  ;;  %77 = vrot.lane.b32.xlu0 %v45_v1, %s909_s15  ;;  %v53_v3 = vld [vmem:[%s1357_s0 + $0x91] sm:$0xff] }
   0x3   :  { %v757_v4 = vld [vmem:[%s1357_s0 + $0xa0] sm:$0xff]  ;;  %v749_v5 = vld [vmem:[%s1357_s0 + $0x10] sm:$0xff]  ;;  %v360_v20 = vld [vmem:[%s1358_s1 + $0x38] sm:$0xff] }
   0x4   :  { %v758_v6 = vld [vmem:[%s1357_s0 + $0xb0] sm:$0xff]  ;;  %v750_v7 = vld [vmem:[%s1357_s0 + $0x20] sm:$0xff]  ;;  %38 = vst.msk [vmem:[#allocation2 + $0x48] sm:$0xff] %vm28_vm0, %v757_v4  ;;  %30 = vst.msk [vmem:[#allocation2 + $0x8] sm:$0xff] %vm28_vm0, %v749_v5  ;;  %821 = vmatprep.subr.mxu0 %v360_v20  ;;  %861 = vmatprep.subr.mxu1 %v360_v20 }
   0x5   :  { %39 = vst.msk [vmem:[#allocation2 + $0x50] sm:$0xff] %vm28_vm0, %v758_v6  ;;  %31 = vst.msk [vmem:[#allocation2 + $0x10] sm:$0xff] %vm28_vm0, %v750_v7  ;;  %v963_v8 = vld [vmem:[%s1357_s0 + $0xc0] sm:$0xff]  ;;  %v968_v9 = vld [vmem:[%s1357_s0 + $0x30] sm:$0xff]  ;;  %822 = vmatpush3.msra.mxu0 %v360_v20  ;;  %869 = vmatpush3.msra.mxu1 %v360_v20 }
   0x6   :  { %95 = vrot.lane.b32.xlu1 %v54_v2, %s909_s15  ;;  %93 = vrot.lane.b32.xlu0 %v53_v3, %s909_s15  ;;  %v975_v10 = vld [vmem:[%s1357_s0 + $0xd0] sm:$0xff]  ;;  %v980_v11 = vld [vmem:[%s1357_s0 + $0x40] sm:$0xff]  ;;  %40 = vst.msk [vmem:[#allocation2 + $0x58] sm:$0xff] %vm28_vm0, %v963_v8  ;;  %32 = vst.msk [vmem:[#allocation2 + $0x18] sm:$0xff] %vm28_vm0, %v968_v9 }
   0x7   :  { %41 = vst.msk [vmem:[#allocation2 + $0x60] sm:$0xff] %vm28_vm0, %v975_v10  ;;  %33 = vst.msk [vmem:[#allocation2 + $0x20] sm:$0xff] %vm28_vm0, %v980_v11  ;;  %v993_v12 = vld [vmem:[%s1357_s0 + $0xe0] sm:$0xff]  ;;  %v998_v13 = vld [vmem:[%s1357_s0 + $0x50] sm:$0xff] }
   0x8   :  { %v1003_v14 = vld [vmem:[%s1357_s0 + $0xf0] sm:$0xff]  ;;  %v1008_v15 = vld [vmem:[%s1357_s0 + $0x60] sm:$0xff]  ;;  %42 = vst.msk [vmem:[#allocation2 + $0x68] sm:$0xff] %vm28_vm0, %v993_v12  ;;  %34 = vst.msk [vmem:[#allocation2 + $0x28] sm:$0xff] %vm28_vm0, %v998_v13 }
   0x9   :  { %43 = vst.msk [vmem:[#allocation2 + $0x70] sm:$0xff] %vm28_vm0, %v1003_v14  ;;  %35 = vst.msk [vmem:[#allocation2 + $0x30] sm:$0xff] %vm28_vm0, %v1008_v15  ;;  %v1023_v16 = vld [vmem:[%s1357_s0 + $0x100] sm:$0xff]  ;;  %v1028_v17 = vld [vmem:[%s1357_s0 + $0x70] sm:$0xff] }
   0xa   :  { %191 = vrot.lane.b32.xlu1 %v757_v4, %s910_s14  ;;  %175 = vrot.lane.b32.xlu0 %v749_v5, %s910_s14  ;;  %44 = vst.msk [vmem:[#allocation2 + $0x78] sm:$0xff] %vm28_vm0, %v1023_v16  ;;  %36 = vst.msk [vmem:[#allocation2 + $0x38] sm:$0xff] %vm28_vm0, %v1028_v17  ;;  %v12_v18 = vld [vmem:[%s1357_s0] sm:$0xff]  ;;  %v20_v19 = vld [vmem:[%s1357_s0 + $0x90] sm:$0xff] }
   0xb   :  { %29 = vst.msk [vmem:[#allocation2] sm:$0xff] %vm28_vm0, %v12_v18  ;;  %37 = vst.msk [vmem:[#allocation2 + $0x40] sm:$0xff] %vm28_vm0, %v20_v19  ;;  %v359_v21 = vld [vmem:[%s1358_s1 + $0x30] sm:$0xff]  ;;  %v358_v22 = vld [vmem:[%s1358_s1 + $0x28] sm:$0xff] }
   0xc   :  { %823 = vmatprep.subr.mxu0 %v359_v21  ;;  %862 = vmatprep.subr.mxu1 %v359_v21 }
   0xe   :  { %193 = vrot.lane.b32.xlu1 %v758_v6, %s910_s14  ;;  %177 = vrot.lane.b32.xlu0 %v750_v7, %s910_s14 }
   0xf   :  { %7 = vsyncpa [#allocation4], 0  ;;  %s911_s30 = smov 48   ;;  %v774_v23 = vld [vmem:[%s1357_s0 + $0xb1] sm:$0xff]  ;;  %v766_v24 = vld [vmem:[%s1357_s0 + $0x21] sm:$0xff]  ;;  %824 = vmatpush3.msra.mxu0 %v359_v21  ;;  %870 = vmatpush3.msra.mxu1 %v359_v21  ;;  %vm125_vm1 = vcmask 261248  }
  0x10   :  { %825 = vmatprep.subr.mxu0 %v358_v22  ;;  %863 = vmatprep.subr.mxu1 %v358_v22  ;;  %v357_v25 = vld [vmem:[%s1358_s1 + $0x20] sm:$0xff]  ;;  %v356_v26 = vld [vmem:[%s1358_s1 + $0x18] sm:$0xff]  ;;  %v355_v27 = vld [vmem:[%s1358_s1 + $0x10] sm:$0xff]  ;;  %vm223_vm2 = vcmask 392448   ;;  %vm320_vm3 = vcmask 523648   ;;  %vm361_vm4 = vcmask 523264  }
  0x11   :  { %826 = vmatpush3.msra.mxu0 %v358_v22  ;;  %871 = vmatpush3.msra.mxu1 %v358_v22  ;;  %v56_v28 = vld [vmem:[%s1357_s0 + $0xc1] sm:$0xff]  ;;  %v48_v29 = vld [vmem:[%s1357_s0 + $0x31] sm:$0xff] }
  0x12   :  { %288 = vrot.lane.b32.xlu1 %v54_v2, %s911_s30  ;;  %272 = vrot.lane.b32.xlu0 %v46_v0, %s911_s30  ;;  %v354_v30 = vld [vmem:[%s1358_s1 + $0x8] sm:$0xff]  ;;  %v353_v31 = vld [vmem:[%s1358_s1] sm:$0xff] }
  0x13   :  { %827 = vmatprep.subr.mxu0 %v357_v25  ;;  %864 = vmatprep.subr.mxu1 %v357_v25  ;;  %v776_v32 = vld [vmem:[%s1357_s0 + $0xd1] sm:$0xff]  ;;  %v768_v33 = vld [vmem:[%s1357_s0 + $0x41] sm:$0xff] }
  0x14   :  { %828 = vmatpush3.msra.mxu0 %v357_v25  ;;  %872 = vmatpush3.msra.mxu1 %v357_v25  ;;  %v58_v34 = vld [vmem:[%s1357_s0 + $0xe1] sm:$0xff]  ;;  %v50_v35 = vld [vmem:[%s1357_s0 + $0x51] sm:$0xff] }
  0x15   :  { %829 = vmatprep.subr.mxu0 %v356_v26  ;;  %865 = vmatprep.subr.mxu1 %v356_v26  ;;  %v778_v36 = vld [vmem:[%s1357_s0 + $0xf1] sm:$0xff]  ;;  %v770_v37 = vld [vmem:[%s1357_s0 + $0x61] sm:$0xff] }
  0x16   :  { %290 = vrot.lane.b32.xlu1 %v774_v23, %s911_s30  ;;  %274 = vrot.lane.b32.xlu0 %v766_v24, %s911_s30  ;;  %v60_v38 = vld [vmem:[%s1357_s0 + $0x101] sm:$0xff]  ;;  %v52_v39 = vld [vmem:[%s1357_s0 + $0x71] sm:$0xff] }
  0x17   :  { %830 = vmatpush3.msra.mxu0 %v356_v26  ;;  %873 = vmatpush3.msra.mxu1 %v356_v26  ;;  %v764_v40 = vld [vmem:[%s1357_s0 + $0x110] sm:$0xff]  ;;  %v756_v41 = vld [vmem:[%s1357_s0 + $0x80] sm:$0xff] }
  0x18   :  { %831 = vmatprep.subr.mxu0 %v355_v27  ;;  %866 = vmatprep.subr.mxu1 %v355_v27  ;;  %v780_v42 = vld [vmem:[%s1357_s0 + $0x111] sm:$0xff]  ;;  %v772_v43 = vld [vmem:[%s1357_s0 + $0x81] sm:$0xff]  ;;  %s912_s0 = smov [#allocation3]  }
  0x19   :  { %832 = vmatpush3.msra.mxu0 %v355_v27  ;;  %874 = vmatpush3.msra.mxu1 %v355_v27 }
  0x1a   :  { %97 = vrot.lane.b32.xlu1 %v774_v23, %s909_s15  ;;  %81 = vrot.lane.b32.xlu0 %v766_v24, %s909_s15 }
  0x1b   :  { %833 = vmatprep.subr.mxu0 %v354_v30  ;;  %867 = vmatprep.subr.mxu1 %v354_v30 }
  0x1c   :  { %834 = vmatpush3.msra.mxu0 %v354_v30  ;;  %875 = vmatpush3.msra.mxu1 %v354_v30 }
  0x1d   :  { %835 = vmatprep.subr.mxu0 %v353_v31  ;;  %868 = vmatprep.subr.mxu1 %v353_v31 }
  0x1e   :  { %99 = vrot.lane.b32.xlu1 %v56_v28, %s909_s15  ;;  %83 = vrot.lane.b32.xlu0 %v48_v29, %s909_s15 }
  0x1f   :  { %836 = vmatpush3.msra.mxu0 %v353_v31  ;;  %876 = vmatpush3.msra.mxu1 %v353_v31 }
  0x22   :  { %195 = vrot.lane.b32.xlu1 %v963_v8, %s910_s14  ;;  %179 = vrot.lane.b32.xlu0 %v968_v9, %s910_s14 }
  0x26   :  { %197 = vrot.lane.b32.xlu1 %v975_v10, %s910_s14  ;;  %181 = vrot.lane.b32.xlu0 %v980_v11, %s910_s14 }
  0x2a   :  { %292 = vrot.lane.b32.xlu1 %v56_v28, %s911_s30  ;;  %276 = vrot.lane.b32.xlu0 %v48_v29, %s911_s30 }
  0x2e   :  { %294 = vrot.lane.b32.xlu1 %v776_v32, %s911_s30  ;;  %278 = vrot.lane.b32.xlu0 %v768_v33, %s911_s30 }
  0x32   :  { %101 = vrot.lane.b32.xlu1 %v776_v32, %s909_s15  ;;  %85 = vrot.lane.b32.xlu0 %v768_v33, %s909_s15 }
  0x36   :  { %103 = vrot.lane.b32.xlu1 %v58_v34, %s909_s15  ;;  %87 = vrot.lane.b32.xlu0 %v50_v35, %s909_s15 }
  0x3a   :  { %199 = vrot.lane.b32.xlu1 %v993_v12, %s910_s14  ;;  %183 = vrot.lane.b32.xlu0 %v998_v13, %s910_s14 }
  0x3e   :  { %201 = vrot.lane.b32.xlu1 %v1003_v14, %s910_s14  ;;  %185 = vrot.lane.b32.xlu0 %v1008_v15, %s910_s14 }
  0x42   :  { %296 = vrot.lane.b32.xlu1 %v58_v34, %s911_s30  ;;  %280 = vrot.lane.b32.xlu0 %v50_v35, %s911_s30 }
  0x46   :  { %298 = vrot.lane.b32.xlu1 %v778_v36, %s911_s30  ;;  %282 = vrot.lane.b32.xlu0 %v770_v37, %s911_s30 }
  0x4a   :  { %105 = vrot.lane.b32.xlu1 %v778_v36, %s909_s15  ;;  %89 = vrot.lane.b32.xlu0 %v770_v37, %s909_s15 }
  0x4e   :  { %107 = vrot.lane.b32.xlu1 %v60_v38, %s909_s15  ;;  %91 = vrot.lane.b32.xlu0 %v52_v39, %s909_s15 }
  0x52   :  { %203 = vrot.lane.b32.xlu1 %v1023_v16, %s910_s14  ;;  %187 = vrot.lane.b32.xlu0 %v1028_v17, %s910_s14 }
  0x56   :  { %205 = vrot.lane.b32.xlu1 %v764_v40, %s910_s14  ;;  %189 = vrot.lane.b32.xlu0 %v756_v41, %s910_s14  ;;  %s738_s14 = sshll.u32 %s912_s0, 4  ;;  %s739_s14 = int_to_ptr.vmem [resolvable:$true] %s738_s14 }
  0x57   :  { %p892_p1 = scmp.lt.s32.totalorder %s739_s14, %s739_s14 }
  0x5a   :  { %300 = vrot.lane.b32.xlu1 %v60_v38, %s911_s30  ;;  %284 = vrot.lane.b32.xlu0 %v52_v39, %s911_s30 }
  0x5e   :  { %302 = vrot.lane.b32.xlu1 %v780_v42, %s911_s30  ;;  %286 = vrot.lane.b32.xlu0 %v772_v43, %s911_s30  ;;  %s887_s30 = scalar_lea.vmem %s739_s14, 2048 }
  0x5f   :  { %p888_p0 = scmp.ne.s32.totalorder %s739_s14, %s887_s30  ;;  %p893_p2 = scmp.lt.s32.totalorder %s887_s30, %s887_s30 }
  0x61   :  { %p894_p3 = por %p893_p2, %p892_p1 }
  0x63   :  { %p895_p4 = pnand %p894_p3, %p888_p0 }
  0x74   :  { %v80_v44 = vpop.permute.xlu1 %79  ;;  %v78_v45 = vpop.permute.xlu0 %77 }
  0x75   :  { %127 = vst.msk [vmem:[#allocation2 + $0x8] sm:$0xff] %vm125_vm1, %v80_v44  ;;  %126 = vst.msk [vmem:[#allocation2] sm:$0xff] %vm125_vm1, %v78_v45 }
  0x78   :  { %v96_v46 = vpop.permute.xlu1 %95  ;;  %v94_v47 = vpop.permute.xlu0 %93 }
  0x79   :  { %135 = vst.msk [vmem:[#allocation2 + $0x48] sm:$0xff] %vm125_vm1, %v96_v46  ;;  %134 = vst.msk [vmem:[#allocation2 + $0x40] sm:$0xff] %vm125_vm1, %v94_v47 }
  0x7c   :  { %v192_v48 = vpop.permute.xlu1 %191  ;;  %v176_v49 = vpop.permute.xlu0 %175 }
  0x7d   :  { %232 = vst.msk [vmem:[#allocation2 + $0x40] sm:$0xff] %vm223_vm2, %v192_v48  ;;  %224 = vst.msk [vmem:[#allocation2] sm:$0xff] %vm223_vm2, %v176_v49 }
  0x80   :  { %v194_v50 = vpop.permute.xlu1 %193  ;;  %v178_v51 = vpop.permute.xlu0 %177 }
  0x81   :  { %233 = vst.msk [vmem:[#allocation2 + $0x48] sm:$0xff] %vm223_vm2, %v194_v50  ;;  %225 = vst.msk [vmem:[#allocation2 + $0x8] sm:$0xff] %vm223_vm2, %v178_v51 }
  0x84   :  { %v289_v52 = vpop.permute.xlu1 %288  ;;  %v273_v53 = vpop.permute.xlu0 %272 }
  0x85   :  { %329 = vst.msk [vmem:[#allocation2 + $0x40] sm:$0xff] %vm320_vm3, %v289_v52  ;;  %321 = vst.msk [vmem:[#allocation2] sm:$0xff] %vm320_vm3, %v273_v53 }
  0x88   :  { %v291_v54 = vpop.permute.xlu1 %290  ;;  %v275_v55 = vpop.permute.xlu0 %274 }
  0x89   :  { %330 = vst.msk [vmem:[#allocation2 + $0x48] sm:$0xff] %vm320_vm3, %v291_v54  ;;  %322 = vst.msk [vmem:[#allocation2 + $0x8] sm:$0xff] %vm320_vm3, %v275_v55 }
  0x8c   :  { %v98_v56 = vpop.permute.xlu1 %97  ;;  %v82_v57 = vpop.permute.xlu0 %81  ;;  %v337_v58 = vld [vmem:[#allocation2] sm:$0xff] }
  0x8d   :  { %v345_v59 = vld [vmem:[#allocation2 + $0x40] sm:$0xff]  ;;  %136 = vst.msk [vmem:[#allocation2 + $0x50] sm:$0xff] %vm125_vm1, %v98_v56  ;;  %128 = vst.msk [vmem:[#allocation2 + $0x10] sm:$0xff] %vm125_vm1, %v82_v57  ;;  %837 = vmatprep.mubr.msk.f32.mxu0 %vm361_vm4, %v337_v58 }
  0x8e   :  { %849 = vmatprep.mubr.msk.f32.mxu1 %vm361_vm4, %v345_v59 }
  0x90   :  { %v100_v60 = vpop.permute.xlu1 %99  ;;  %v84_v61 = vpop.permute.xlu0 %83  ;;  %v338_v62 = vld [vmem:[#allocation2 + $0x8] sm:$0xff] }
  0x91   :  { %v346_v63 = vld [vmem:[#allocation2 + $0x48] sm:$0xff]  ;;  %137 = vst.msk [vmem:[#allocation2 + $0x58] sm:$0xff] %vm125_vm1, %v100_v60  ;;  %129 = vst.msk [vmem:[#allocation2 + $0x18] sm:$0xff] %vm125_vm1, %v84_v61  ;;  %838 = vmatmul.mubr.msk.f32.vlgmr.msra.gmra.mxu0 %vm361_vm4, %v338_v62 }
  0x92   :  { %850 = vmatmul.mubr.msk.f32.vlgmr.msra.gmra.mxu1 %vm361_vm4, %v346_v63 }
  0x94   :  { %v196_v0 = vpop.permute.xlu1 %195  ;;  %v180_v1 = vpop.permute.xlu0 %179 }
  0x95   :  { %234 = vst.msk [vmem:[#allocation2 + $0x50] sm:$0xff] %vm223_vm2, %v196_v0  ;;  %226 = vst.msk [vmem:[#allocation2 + $0x10] sm:$0xff] %vm223_vm2, %v180_v1 }
  0x98   :  { %v198_v2 = vpop.permute.xlu1 %197  ;;  %v182_v3 = vpop.permute.xlu0 %181 }
  0x99   :  { %235 = vst.msk [vmem:[#allocation2 + $0x58] sm:$0xff] %vm223_vm2, %v198_v2  ;;  %227 = vst.msk [vmem:[#allocation2 + $0x18] sm:$0xff] %vm223_vm2, %v182_v3 }
  0x9c   :  { %v293_v4 = vpop.permute.xlu1 %292  ;;  %v277_v5 = vpop.permute.xlu0 %276 }
  0x9d   :  { %331 = vst.msk [vmem:[#allocation2 + $0x50] sm:$0xff] %vm320_vm3, %v293_v4  ;;  %323 = vst.msk [vmem:[#allocation2 + $0x10] sm:$0xff] %vm320_vm3, %v277_v5 }
  0xa0   :  { %v295_v6 = vpop.permute.xlu1 %294  ;;  %v279_v7 = vpop.permute.xlu0 %278 }
  0xa1   :  { %332 = vst.msk [vmem:[#allocation2 + $0x58] sm:$0xff] %vm320_vm3, %v295_v6  ;;  %324 = vst.msk [vmem:[#allocation2 + $0x18] sm:$0xff] %vm320_vm3, %v279_v7 }
  0xa4   :  { %v102_v8 = vpop.permute.xlu1 %101  ;;  %v86_v9 = vpop.permute.xlu0 %85  ;;  %v339_v10 = vld [vmem:[#allocation2 + $0x10] sm:$0xff] }
  0xa5   :  { %v347_v11 = vld [vmem:[#allocation2 + $0x50] sm:$0xff]  ;;  %138 = vst.msk [vmem:[#allocation2 + $0x60] sm:$0xff] %vm125_vm1, %v102_v8  ;;  %130 = vst.msk [vmem:[#allocation2 + $0x20] sm:$0xff] %vm125_vm1, %v86_v9  ;;  %840 = vmatprep.mubr.msk.f32.mxu0 %vm361_vm4, %v339_v10 }
  0xa6   :  { %852 = vmatprep.mubr.msk.f32.mxu1 %vm361_vm4, %v347_v11 }
  0xa8   :  { %v104_v12 = vpop.permute.xlu1 %103  ;;  %v88_v13 = vpop.permute.xlu0 %87  ;;  %v340_v14 = vld [vmem:[#allocation2 + $0x18] sm:$0xff] }
  0xa9   :  { %v348_v15 = vld [vmem:[#allocation2 + $0x58] sm:$0xff]  ;;  %139 = vst.msk [vmem:[#allocation2 + $0x68] sm:$0xff] %vm125_vm1, %v104_v12  ;;  %131 = vst.msk [vmem:[#allocation2 + $0x28] sm:$0xff] %vm125_vm1, %v88_v13  ;;  %841 = vmatmul.mubr.msk.f32.gmra.mxu0 %vm361_vm4, %v340_v14 }
  0xaa   :  { %853 = vmatmul.mubr.msk.f32.gmra.mxu1 %vm361_vm4, %v348_v15 }
  0xac   :  { %v200_v16 = vpop.permute.xlu1 %199  ;;  %v184_v17 = vpop.permute.xlu0 %183 }
  0xad   :  { %236 = vst.msk [vmem:[#allocation2 + $0x60] sm:$0xff] %vm223_vm2, %v200_v16  ;;  %228 = vst.msk [vmem:[#allocation2 + $0x20] sm:$0xff] %vm223_vm2, %v184_v17 }
  0xb0   :  { %v202_v18 = vpop.permute.xlu1 %201  ;;  %v186_v19 = vpop.permute.xlu0 %185 }
  0xb1   :  { %237 = vst.msk [vmem:[#allocation2 + $0x68] sm:$0xff] %vm223_vm2, %v202_v18  ;;  %229 = vst.msk [vmem:[#allocation2 + $0x28] sm:$0xff] %vm223_vm2, %v186_v19 }
  0xb4   :  { %v297_v20 = vpop.permute.xlu1 %296  ;;  %v281_v21 = vpop.permute.xlu0 %280 }
  0xb5   :  { %333 = vst.msk [vmem:[#allocation2 + $0x60] sm:$0xff] %vm320_vm3, %v297_v20  ;;  %325 = vst.msk [vmem:[#allocation2 + $0x20] sm:$0xff] %vm320_vm3, %v281_v21 }
  0xb8   :  { %v299_v22 = vpop.permute.xlu1 %298  ;;  %v283_v23 = vpop.permute.xlu0 %282 }
  0xb9   :  { %334 = vst.msk [vmem:[#allocation2 + $0x68] sm:$0xff] %vm320_vm3, %v299_v22  ;;  %326 = vst.msk [vmem:[#allocation2 + $0x28] sm:$0xff] %vm320_vm3, %v283_v23 }
  0xbc   :  { %v106_v24 = vpop.permute.xlu1 %105  ;;  %v90_v25 = vpop.permute.xlu0 %89  ;;  %v341_v26 = vld [vmem:[#allocation2 + $0x20] sm:$0xff] }
  0xbd   :  { %v349_v27 = vld [vmem:[#allocation2 + $0x60] sm:$0xff]  ;;  %140 = vst.msk [vmem:[#allocation2 + $0x70] sm:$0xff] %vm125_vm1, %v106_v24  ;;  %132 = vst.msk [vmem:[#allocation2 + $0x30] sm:$0xff] %vm125_vm1, %v90_v25  ;;  %843 = vmatprep.mubr.msk.f32.mxu0 %vm361_vm4, %v341_v26 }
  0xbe   :  { %855 = vmatprep.mubr.msk.f32.mxu1 %vm361_vm4, %v349_v27 }
  0xc0   :  { %v108_v28 = vpop.permute.xlu1 %107  ;;  %v92_v29 = vpop.permute.xlu0 %91  ;;  %v342_v30 = vld [vmem:[#allocation2 + $0x28] sm:$0xff] }
  0xc1   :  { %v350_v31 = vld [vmem:[#allocation2 + $0x68] sm:$0xff]  ;;  %141 = vst.msk [vmem:[#allocation2 + $0x78] sm:$0xff] %vm125_vm1, %v108_v28  ;;  %133 = vst.msk [vmem:[#allocation2 + $0x38] sm:$0xff] %vm125_vm1, %v92_v29  ;;  %844 = vmatmul.mubr.msk.f32.gmra.mxu0 %vm361_vm4, %v342_v30 }
  0xc2   :  { %856 = vmatmul.mubr.msk.f32.gmra.mxu1 %vm361_vm4, %v350_v31 }
  0xc4   :  { %v204_v32 = vpop.permute.xlu1 %203  ;;  %v188_v33 = vpop.permute.xlu0 %187 }
  0xc5   :  { %238 = vst.msk [vmem:[#allocation2 + $0x70] sm:$0xff] %vm223_vm2, %v204_v32  ;;  %230 = vst.msk [vmem:[#allocation2 + $0x30] sm:$0xff] %vm223_vm2, %v188_v33 }
  0xc8   :  { %v206_v34 = vpop.permute.xlu1 %205  ;;  %v190_v35 = vpop.permute.xlu0 %189 }
  0xc9   :  { %239 = vst.msk [vmem:[#allocation2 + $0x78] sm:$0xff] %vm223_vm2, %v206_v34  ;;  %231 = vst.msk [vmem:[#allocation2 + $0x38] sm:$0xff] %vm223_vm2, %v190_v35 }
  0xcc   :  { %v301_v36 = vpop.permute.xlu1 %300  ;;  %v285_v37 = vpop.permute.xlu0 %284 }
  0xcd   :  { %335 = vst.msk [vmem:[#allocation2 + $0x70] sm:$0xff] %vm320_vm3, %v301_v36  ;;  %327 = vst.msk [vmem:[#allocation2 + $0x30] sm:$0xff] %vm320_vm3, %v285_v37 }
  0xd0   :  { %v303_v38 = vpop.permute.xlu1 %302  ;;  %v287_v39 = vpop.permute.xlu0 %286 }
  0xd1   :  { %336 = vst.msk [vmem:[#allocation2 + $0x78] sm:$0xff] %vm320_vm3, %v303_v38  ;;  %328 = vst.msk [vmem:[#allocation2 + $0x38] sm:$0xff] %vm320_vm3, %v287_v39 }
  0xd4   :  { %v343_v40 = vld [vmem:[#allocation2 + $0x30] sm:$0xff] }
  0xd5   :  { %v351_v41 = vld [vmem:[#allocation2 + $0x70] sm:$0xff]  ;;  %846 = vmatprep.mubr.msk.f32.mxu0 %vm361_vm4, %v343_v40 }
  0xd6   :  { %858 = vmatprep.mubr.msk.f32.mxu1 %vm361_vm4, %v351_v41 }
  0xd8   :  { %v344_v42 = vld [vmem:[#allocation2 + $0x38] sm:$0xff] }
  0xd9   :  { %v352_v43 = vld [vmem:[#allocation2 + $0x78] sm:$0xff]  ;;  %847 = vmatmul.mubr.msk.f32.gmra.mxu0 %vm361_vm4, %v344_v42 }
  0xda   :  { %859 = vmatmul.mubr.msk.f32.gmra.mxu1 %vm361_vm4, %v352_v43 }
 0x151   :  { %v1230_v44 = vpop.f32.mrf.mxu0 }
 0x152   :  { %v1232_v45 = vpop.f32.mrf.mxu1  ;;  %v584_v56 = vmul.f32 %v1230_v44, %v1230_v44 }
 0x153   :  { %v1234_v46 = vpop.f32.mrf.mxu0  ;;  %v592_v57 = vmul.f32 %v1232_v45, %v1232_v45 }
 0x154   :  { %v1236_v47 = vpop.f32.mrf.mxu1  ;;  %v583_v52 = vmul.f32 %v1234_v46, %v1234_v46  ;;  %v555_v60 = vadd.f32 %v1230_v44, %v1234_v46 }
 0x155   :  { %v591_v53 = vmul.f32 %v1236_v47, %v1236_v47  ;;  %v568_v61 = vadd.f32 %v1232_v45, %v1236_v47 }
 0x156   :  { %v599_v62 = vadd.f32 %v584_v56, %v583_v52 }
 0x157   :  { %v612_v63 = vadd.f32 %v592_v57, %v591_v53 }
 0x169   :  { %v1238_v48 = vpop.f32.mrf.mxu0 }
 0x16a   :  { %v1240_v49 = vpop.f32.mrf.mxu1  ;;  %v586_v6 = vmul.f32 %v1238_v48, %v1238_v48 }
 0x16b   :  { %v1242_v50 = vpop.f32.mrf.mxu0  ;;  %v594_v7 = vmul.f32 %v1240_v49, %v1240_v49 }
 0x16c   :  { %v1244_v51 = vpop.f32.mrf.mxu1  ;;  %v585_v58 = vmul.f32 %v1242_v50, %v1242_v50  ;;  %v556_v0 = vadd.f32 %v555_v60, %v1242_v50 }
 0x16d   :  { %v593_v59 = vmul.f32 %v1244_v51, %v1244_v51  ;;  %v569_v1 = vadd.f32 %v568_v61, %v1244_v51 }
 0x16e   :  { %v600_v4 = vadd.f32 %v599_v62, %v585_v58  ;;  %v557_v10 = vadd.f32 %v1238_v48, %v556_v0 }
 0x16f   :  { %v613_v5 = vadd.f32 %v612_v63, %v593_v59  ;;  %v570_v11 = vadd.f32 %v1240_v49, %v569_v1 }
 0x170   :  { %v601_v12 = vadd.f32 %v600_v4, %v586_v6 }
 0x171   :  { %v614_v13 = vadd.f32 %v613_v5, %v594_v7 }
 0x181   :  { %v1250_v54 = vpop.f32.mrf.mxu0 }
 0x182   :  { %v1252_v55 = vpop.f32.mrf.mxu1  ;;  %v588_v18 = vmul.f32 %v1250_v54, %v1250_v54 }
 0x183   :  { %v1268_v2 = vpop.f32.mrf.mxu0  ;;  %v596_v19 = vmul.f32 %v1252_v55, %v1252_v55 }
 0x184   :  { %v1270_v3 = vpop.f32.mrf.mxu1  ;;  %v587_v8 = vmul.f32 %v1268_v2, %v1268_v2  ;;  %v558_v14 = vadd.f32 %v557_v10, %v1268_v2 }
 0x185   :  { %v595_v9 = vmul.f32 %v1270_v3, %v1270_v3  ;;  %v571_v15 = vadd.f32 %v570_v11, %v1270_v3 }
 0x186   :  { %v602_v16 = vadd.f32 %v601_v12, %v587_v8  ;;  %v559_v22 = vadd.f32 %v1250_v54, %v558_v14 }
 0x187   :  { %v615_v17 = vadd.f32 %v614_v13, %v595_v9  ;;  %v572_v23 = vadd.f32 %v1252_v55, %v571_v15 }
 0x188   :  { %v603_v25 = vadd.f32 %v602_v16, %v588_v18 }
 0x189   :  { %v616_v27 = vadd.f32 %v615_v17, %v596_v19 }
 0x199   :  { %v1288_v20 = vpop.f32.mrf.mxu0 }
 0x19a   :  { %v1290_v21 = vpop.f32.mrf.mxu1  ;;  %v590_v32 = vmul.f32 %v1288_v20, %v1288_v20 }
 0x19b   :  { %v1294_v24 = vpop.f32.mrf.mxu0  ;;  %v598_v33 = vmul.f32 %v1290_v21, %v1290_v21 }
 0x19c   :  { %v1296_v26 = vpop.f32.mrf.mxu1  ;;  %v560_v28 = vadd.f32 %v559_v22, %v1294_v24  ;;  %v589_v29 = vmul.f32 %v1294_v24, %v1294_v24 }
 0x19d   :  { %v573_v30 = vadd.f32 %v572_v23, %v1296_v26  ;;  %v597_v31 = vmul.f32 %v1296_v26, %v1296_v26 }
 0x19e   :  { %v561_v34 = vadd.f32 %v1288_v20, %v560_v28  ;;  %v604_v35 = vadd.f32 %v603_v25, %v589_v29 }
 0x19f   :  { %v574_v36 = vadd.f32 %v1290_v21, %v573_v30  ;;  %v617_v37 = vadd.f32 %v616_v27, %v597_v31 }
 0x1a0   :  { %v562_v38 = vrot.slane %v561_v34, 4  ;;  %v605_v39 = vadd.f32 %v604_v35, %v590_v32 }
 0x1a1   :  { %v575_v40 = vrot.slane %v574_v36, 4  ;;  %v618_v41 = vadd.f32 %v617_v37, %v598_v33 }
 0x1a2   :  { %v563_v42 = vadd.f32 %v562_v38, %v561_v34  ;;  %v606_v43 = vrot.slane %v605_v39, 4 }
 0x1a3   :  { %v576_v52 = vadd.f32 %v575_v40, %v574_v36  ;;  %v619_v53 = vrot.slane %v618_v41, 4 }
 0x1a4   :  { %v564_v56 = vrot.slane %v563_v42, 2  ;;  %v607_v57 = vadd.f32 %v606_v43, %v605_v39 }
 0x1a5   :  { %v577_v58 = vrot.slane %v576_v52, 2  ;;  %v620_v59 = vadd.f32 %v619_v53, %v618_v41 }
 0x1a6   :  { %v565_v60 = vadd.f32 %v564_v56, %v563_v42  ;;  %v608_v61 = vrot.slane %v607_v57, 2 }
 0x1a7   :  { %v578_v62 = vadd.f32 %v577_v58, %v576_v52  ;;  %v621_v63 = vrot.slane %v620_v59, 2 }
 0x1a8   :  { %v566_v0 = vrot.slane %v565_v60, 1  ;;  %v609_v1 = vadd.f32 %v608_v61, %v607_v57 }
 0x1a9   :  { %v579_v4 = vrot.slane %v578_v62, 1  ;;  %v622_v5 = vadd.f32 %v621_v63, %v620_v59 }
 0x1aa   :  { %v567_v6 = vadd.f32 %v566_v0, %v565_v60  ;;  %v610_v7 = vrot.slane %v609_v1, 1 }
 0x1ab   :  { %v580_v8 = vadd.f32 %v579_v4, %v578_v62  ;;  %v623_v9 = vrot.slane %v622_v5, 1 }
 0x1ac   :  { %v581_v10 = vmul.f32 0.015625, %v567_v6  ;;  %v611_v11 = vadd.f32 %v610_v7, %v609_v1 }
 0x1ad   :  { %v624_v12 = vadd.f32 %v623_v9, %v622_v5  ;;  %v1310_v13 = vmul.f32 0.015625, %v580_v8 }
 0x1ae   :  { %v625_v14 = vmul.f32 0.015625, %v611_v11  ;;  %v627_v15 = vmul.f32 %v581_v10, %v581_v10  ;;  %v633_v28 = vsub.f32 %v1234_v46, %v581_v10  ;;  %v634_v29 = vsub.f32 %v1230_v44, %v581_v10 }
 0x1af   :  { %v626_v17 = vmul.f32 0.015625, %v624_v12  ;;  %v628_v18 = vmul.f32 %v1310_v13, %v1310_v13  ;;  %v635_v30 = vsub.f32 %v1242_v50, %v581_v10  ;;  %v636_v31 = vsub.f32 %v1238_v48, %v581_v10 }
 0x1b0   :  { %v629_v16 = vsub.f32 %v625_v14, %v627_v15  ;;  %v637_v32 = vsub.f32 %v1268_v2, %v581_v10  ;;  %v638_v33 = vsub.f32 %v1250_v54, %v581_v10  ;;  %v639_v34 = vsub.f32 %v1294_v24, %v581_v10 }
 0x1b1   :  { %v630_v22 = vsub.f32 %v626_v17, %v628_v18  ;;  %v640_v35 = vsub.f32 %v1288_v20, %v581_v10  ;;  %v641_v36 = vsub.f32 %v1236_v47, %v1310_v13  ;;  %v642_v46 = vsub.f32 %v1232_v45, %v1310_v13 }
 0x1b2   :  { %v631_v19 = vmax.f32 %v629_v16, 0.0  ;;  %v643_v44 = vsub.f32 %v1244_v51, %v1310_v13  ;;  %v644_v48 = vsub.f32 %v1240_v49, %v1310_v13  ;;  %v645_v54 = vsub.f32 %v1270_v3, %v1310_v13 }
 0x1b3   :  { %v632_v25 = vmax.f32 %v630_v22, 0.0  ;;  %v646_v2 = vsub.f32 %v1252_v55, %v1310_v13  ;;  %v647_v20 = vsub.f32 %v1296_v26, %v1310_v13  ;;  %v648_v47 = vsub.f32 %v1290_v21, %v1310_v13 }
 0x1b4   :  { %v649_v23 = vadd.f32 1e-05, %v631_v19 }
 0x1b5   :  { %v650_v27 = vadd.f32 1e-05, %v632_v25 }
 0x1b6   :  { %883 = vrsqrt.f32 %v649_v23 }
 0x1b7   :  { %885 = vrsqrt.f32 %v650_v27 }
 0x1c3   :  { %v884_v50 = vpop.eup %883 }
 0x1c4   :  { %v653_v45 = vmul.f32 %v884_v50, %v633_v28  ;;  %v654_v24 = vmul.f32 %v884_v50, %v634_v29  ;;  %v655_v37 = vmul.f32 %v884_v50, %v635_v30  ;;  %v656_v51 = vmul.f32 %v884_v50, %v636_v31  ;;  %v886_v41 = vpop.eup %885 }
 0x1c5   :  { %v657_v38 = vmul.f32 %v884_v50, %v637_v32  ;;  %v658_v39 = vmul.f32 %v884_v50, %v638_v33  ;;  %v659_v49 = vmul.f32 %v884_v50, %v639_v34  ;;  %v660_v40 = vmul.f32 %v884_v50, %v640_v35 }
 0x1c6   :  { %vm669_vm5 = vcmp.ge.f32.partialorder %v653_v45, 0.0  ;;  %vm670_vm6 = vcmp.ge.f32.partialorder %v654_v24, 0.0  ;;  %vm671_vm7 = vcmp.ge.f32.partialorder %v655_v37, 0.0  ;;  %vm672_vm8 = vcmp.ge.f32.partialorder %v656_v51, 0.0 }
 0x1c7   :  { %vm673_vm9 = vcmp.ge.f32.partialorder %v657_v38, 0.0  ;;  %vm674_vm10 = vcmp.ge.f32.partialorder %v658_v39, 0.0  ;;  %vm675_vm11 = vcmp.ge.f32.partialorder %v659_v49, 0.0  ;;  %vm676_vm12 = vcmp.ge.f32.partialorder %v660_v40, 0.0 }
 0x1c8   :  { %v685_v55 = vmul.f32 0.2, %v653_v45  ;;  %v686_v3 = vmul.f32 0.2, %v654_v24  ;;  %v687_v21 = vmul.f32 0.2, %v655_v37  ;;  %v661_v26 = vmul.f32 %v886_v41, %v641_v36 }
 0x1c9   :  { %v688_v42 = vmul.f32 0.2, %v656_v51  ;;  %v689_v43 = vmul.f32 0.2, %v657_v38  ;;  %v690_v52 = vmul.f32 0.2, %v658_v39  ;;  %v662_v53 = vmul.f32 %v886_v41, %v642_v46 }
 0x1ca   :  { %v691_v56 = vmul.f32 0.2, %v659_v49  ;;  %v692_v57 = vmul.f32 0.2, %v660_v40  ;;  %v701_v58 = vsel %vm669_vm5, %v653_v45, %v685_v55  ;;  %v702_v59 = vsel %vm670_vm6, %v654_v24, %v686_v3 }
 0x1cb   :  { %v703_v60 = vsel %vm671_vm7, %v655_v37, %v687_v21  ;;  %v704_v61 = vsel %vm672_vm8, %v656_v51, %v688_v42  ;;  %v705_v62 = vsel %vm673_vm9, %v657_v38, %v689_v43  ;;  %v706_v63 = vsel %vm674_vm10, %v658_v39, %v690_v52  ;;  %717 = vst [vmem:[#allocation3] sm:$0xff] %v701_v58 }
 0x1cc   :  { %718 = vst [vmem:[#allocation3 + $0x8] sm:$0xff] %v702_v59  ;;  %v707_v0 = vsel %vm675_vm11, %v659_v49, %v691_v56  ;;  %v708_v1 = vsel %vm676_vm12, %v660_v40, %v692_v57  ;;  %719 = vst [vmem:[#allocation3 + $0x10] sm:$0xff] %v703_v60  ;;  %v663_v4 = vmul.f32 %v886_v41, %v643_v44  ;;  %vm677_vm13 = vcmp.ge.f32.partialorder %v661_v26, 0.0 }
 0x1cd   :  { %720 = vst [vmem:[#allocation3 + $0x18] sm:$0xff] %v704_v61  ;;  %721 = vst [vmem:[#allocation3 + $0x20] sm:$0xff] %v705_v62  ;;  %v664_v5 = vmul.f32 %v886_v41, %v644_v48  ;;  %v665_v6 = vmul.f32 %v886_v41, %v645_v54  ;;  %v666_v7 = vmul.f32 %v886_v41, %v646_v2  ;;  %vm678_vm14 = vcmp.ge.f32.partialorder %v662_v53, 0.0 }
 0x1ce   :  { %722 = vst [vmem:[#allocation3 + $0x28] sm:$0xff] %v706_v63  ;;  %723 = vst [vmem:[#allocation3 + $0x30] sm:$0xff] %v707_v0  ;;  %v667_v8 = vmul.f32 %v886_v41, %v647_v20  ;;  %v668_v9 = vmul.f32 %v886_v41, %v648_v47  ;;  %vm679_vm15 = vcmp.ge.f32.partialorder %v663_v4, 0.0  ;;  %v693_v10 = vmul.f32 0.2, %v661_v26 }
 0x1cf   :  { %724 = vst [vmem:[#allocation3 + $0x38] sm:$0xff] %v708_v1  ;;  %vm680_vm0 = vcmp.ge.f32.partialorder %v664_v5, 0.0  ;;  %vm681_vm1 = vcmp.ge.f32.partialorder %v665_v6, 0.0  ;;  %vm682_vm2 = vcmp.ge.f32.partialorder %v666_v7, 0.0  ;;  %v694_v11 = vmul.f32 0.2, %v662_v53 }
 0x1d0   :  { %vm683_vm3 = vcmp.ge.f32.partialorder %v667_v8, 0.0  ;;  %vm684_vm4 = vcmp.ge.f32.partialorder %v668_v9, 0.0  ;;  %v695_v12 = vmul.f32 0.2, %v663_v4  ;;  %v696_v13 = vmul.f32 0.2, %v664_v5 }
 0x1d1   :  { %v697_v14 = vmul.f32 0.2, %v665_v6  ;;  %v698_v15 = vmul.f32 0.2, %v666_v7  ;;  %v699_v16 = vmul.f32 0.2, %v667_v8  ;;  %v709_v18 = vsel %vm677_vm13, %v661_v26, %v693_v10 }
 0x1d2   :  { %v700_v17 = vmul.f32 0.2, %v668_v9  ;;  %v710_v19 = vsel %vm678_vm14, %v662_v53, %v694_v11  ;;  %v711_v22 = vsel %vm679_vm15, %v663_v4, %v695_v12  ;;  %v712_v23 = vsel %vm680_vm0, %v664_v5, %v696_v13  ;;  %725 = vst [vmem:[#allocation3 + $0x40] sm:$0xff] %v709_v18 }
 0x1d3   :  { %v713_v25 = vsel %vm681_vm1, %v665_v6, %v697_v14  ;;  %v714_v27 = vsel %vm682_vm2, %v666_v7, %v698_v15  ;;  %726 = vst [vmem:[#allocation3 + $0x48] sm:$0xff] %v710_v19  ;;  %v715_v28 = vsel %vm683_vm3, %v667_v8, %v699_v16  ;;  %727 = vst [vmem:[#allocation3 + $0x50] sm:$0xff] %v711_v22 }
 0x1d4   :  { %v716_v29 = vsel %vm684_vm4, %v668_v9, %v700_v17  ;;  %728 = vst [vmem:[#allocation3 + $0x58] sm:$0xff] %v712_v23  ;;  %729 = vst [vmem:[#allocation3 + $0x60] sm:$0xff] %v713_v25 }
 0x1d5   :  { %730 = vst [vmem:[#allocation3 + $0x68] sm:$0xff] %v714_v27  ;;  %731 = vst [vmem:[#allocation3 + $0x70] sm:$0xff] %v715_v28 }
 0x1d6   :  { %732 = vst [vmem:[#allocation3 + $0x78] sm:$0xff] %v716_v29 }
 0x1d7   :  { %898 = shalt.err (!%p895_p4)
}
 0x1d8   :  { %s913_s20 = smov 128   ;;  %s914_s21 = smov 8  }
 0x1d9   :  { %744 = dma.vmem_to_hbm [thread:$0]  %s739_s14, 2048, %s1359_s2, [#allocation4], %s913_s20, %s913_s20, %s914_s21  }
 0x1da   :  { %907 = dma.done.wait [#allocation4], 2048  }
 0x1db   :  { %908 = vsyncadd [#allocation4], 4294965248 }
 0x1dc   :  { %748 = vsyncpa [#allocation4], 1 }

</bundles_post_ra>
